<compile_context>
chip_gen: v7x
topology: tpu7x:2x2x1
jax: 0.10.0
libtpu: 0.0.40
codegen_flags: <defaults>
</compile_context>

<pallas_src>
import functools

import jax
import jax.numpy as jnp
from jax.experimental import pallas as pl
from jax.experimental.pallas import tpu as pltpu


def _round_up(a, b):
    return (a + b - 1) // b * b


def _gelu_exact(x):
    # matches torch.nn.functional.gelu default (erf-based). Python-float
    # constants only (jnp scalars here would become captured jaxpr consts).
    return 0.5 * x * (1.0 + jax.lax.erf(x * 0.7071067811865476))


def _layer_norm_f32(x_f32, lnw, lnb, eps):
    mean = jnp.mean(x_f32, axis=-1, keepdims=True)
    centered = x_f32 - mean
    var = jnp.mean(centered * centered, axis=-1, keepdims=True)
    inv = jax.lax.rsqrt(var + eps)
    return centered * inv * lnw + lnb


def _ffn_kernel(x_ref, lnw_ref, lnb_ref, w1_ref, b1_ref, w2_ref, b2_ref,
                o_ref, *, eps):
    """Non-gated: LN -> x@W1+b1 -> gelu -> @W2+b2 -> (+x)."""
    x_ln = _layer_norm_f32(x_ref[...].astype(jnp.float32),
                           lnw_ref[...], lnb_ref[...], eps)
    # MXU fed in the (bf16) weight dtype, accumulate in f32.
    pre = jnp.dot(x_ln.astype(w1_ref.dtype), w1_ref[...],
                  preferred_element_type=jnp.float32) + b1_ref[...]
    hid = _gelu_exact(pre)
    out = jnp.dot(hid.astype(w2_ref.dtype), w2_ref[...],
                  preferred_element_type=jnp.float32) + b2_ref[...]
    # TODO(synk): dropout is identity (p=0.0 / eval); training-mode dropout
    # would use pltpu.prng_seed + pltpu.prng_random_bits.
    # Residual with the *un-normalized* input: re-read x_ref (short live range).
    o_ref[...] = (out + x_ref[...].astype(jnp.float32)).astype(o_ref.dtype)


def _ffn_gated_kernel(x_ref, lnw_ref, lnb_ref, wg_ref, bg_ref, wl_ref, bl_ref,
                      w2_ref, b2_ref, o_ref, *, eps):
    """Gated: LN -> gelu(x@Wg+bg) * (x@Wl+bl) -> @W2+b2 -> (+x)."""
    x_ln = _layer_norm_f32(x_ref[...].astype(jnp.float32),
                           lnw_ref[...], lnb_ref[...], eps)
    x_mxu = x_ln.astype(wg_ref.dtype)
    gate = jnp.dot(x_mxu, wg_ref[...],
                   preferred_element_type=jnp.float32) + bg_ref[...]
    lin = jnp.dot(x_mxu, wl_ref[...],
                  preferred_element_type=jnp.float32) + bl_ref[...]
    hid = _gelu_exact(gate) * lin
    out = jnp.dot(hid.astype(w2_ref.dtype), w2_ref[...],
                  preferred_element_type=jnp.float32) + b2_ref[...]
    o_ref[...] = (out + x_ref[...].astype(jnp.float32)).astype(o_ref.dtype)


def prepare_lean_ffn_params(ln_weight, ln_bias, i2h_weight, i2h_bias,
                            h2o_weight, h2o_bias, *, gated=False,
                            mxu_dtype=jnp.bfloat16):
    """One-time parameter prep: transpose PyTorch (out,in) weights to (in,out),
    split the gated i2h weight, cast matmul weights to the MXU dtype."""
    hidden = ln_weight.shape[0]
    intermediate = h2o_weight.shape[1]
    params = dict(
        lnw=ln_weight.reshape(1, hidden).astype(jnp.float32),
        lnb=ln_bias.reshape(1, hidden).astype(jnp.float32),
        w2=jnp.transpose(h2o_weight).astype(mxu_dtype),            # (I, H)
        b2=h2o_bias.reshape(1, hidden).astype(jnp.float32),
    )
    if gated:
        params.update(
            wg=jnp.transpose(i2h_weight[:intermediate]).astype(mxu_dtype),  # (H, I)
            bg=i2h_bias[:intermediate].reshape(1, intermediate).astype(jnp.float32),
            wl=jnp.transpose(i2h_weight[intermediate:]).astype(mxu_dtype),  # (H, I)
            bl=i2h_bias[intermediate:].reshape(1, intermediate).astype(jnp.float32),
        )
    else:
        params.update(
            w1=jnp.transpose(i2h_weight).astype(mxu_dtype),                 # (H, I)
            b1=i2h_bias.reshape(1, intermediate).astype(jnp.float32),
        )
    return params


def lean_ffn(x, params, *, gated=False, layer_norm_eps=1e-12, tm=512):
    """Forward pass of LeanFFN. x: (..., hidden); params from prepare_lean_ffn_params."""
    orig_shape = x.shape
    hidden = x.shape[-1]
    x2d = x.reshape(-1, hidden)
    n_tokens = x2d.shape[0]

    intermediate = params["w2"].shape[0]
    i2h_out = 2 * intermediate if gated else intermediate

    # Token tile: multiple of 8 sublanes, capped by the problem size.
    tm = _round_up(max(8, min(tm, n_tokens)), 8)
    n_pad = _round_up(n_tokens, tm)
    if n_pad != n_tokens:
        x2d = jnp.pad(x2d, ((0, n_pad - n_tokens), (0, 0)))
    grid = (n_pad // tm,)

    if gated:
        kernel = functools.partial(_ffn_gated_kernel, eps=float(layer_norm_eps))
        operands = (x2d, params["lnw"], params["lnb"],
                    params["wg"], params["bg"], params["wl"], params["bl"],
                    params["w2"], params["b2"])
    else:
        kernel = functools.partial(_ffn_kernel, eps=float(layer_norm_eps))
        operands = (x2d, params["lnw"], params["lnb"],
                    params["w1"], params["b1"],
                    params["w2"], params["b2"])

    # x / out are tiled over tokens; weights & biases stay resident (index (0,0)).
    in_specs = [pl.BlockSpec((tm, hidden), lambda i: (i, 0))]
    in_specs += [pl.BlockSpec(op.shape, lambda i: (0, 0)) for op in operands[1:]]
    out_spec = pl.BlockSpec((tm, hidden), lambda i: (i, 0))
    # NOTE: hidden should ideally be a multiple of 128 for lane-dense stores;
    # the toy config (hidden=32) equals the full array dim so it is still legal.

    # Rough VMEM budget: resident weights + double-buffered x/out tiles + f32
    # intermediates; keep it within v7x's 64 MiB physical VMEM.
    itemsize = x2d.dtype.itemsize
    weight_bytes = sum(int(p.size) * p.dtype.itemsize for p in operands[1:])
    act_bytes = 2 * 2 * tm * hidden * itemsize
    inter_bytes = 4 * tm * (i2h_out + intermediate + 2 * hidden)
    vmem_limit = int(min(64 << 20,
                         max(32 << 20, 2 * (2 * weight_bytes + act_bytes + inter_bytes))))

    flops = 2 * n_pad * hidden * i2h_out + 2 * n_pad * intermediate * hidden
    bytes_accessed = (2 * n_pad * hidden * itemsize + weight_bytes)
    cost = pl.CostEstimate(flops=int(flops),
                           transcendentals=int(n_pad * intermediate),
                           bytes_accessed=int(bytes_accessed))

    out2d = pl.pallas_call(
        kernel,
        out_shape=jax.ShapeDtypeStruct((n_pad, hidden), x.dtype),
        grid=grid,
        in_specs=in_specs,
        out_specs=out_spec,
        compiler_params=pltpu.CompilerParams(
            dimension_semantics=("parallel",),
            vmem_limit_bytes=vmem_limit),
        cost_estimate=cost,
    )(*operands)

    if n_pad != n_tokens:
        out2d = out2d[:n_tokens]
    return out2d.reshape(orig_shape)


def _reference(x, ln_weight, ln_bias, i2h_weight, i2h_bias, h2o_weight,
               h2o_bias, *, gated=False, eps=1e-12):
    """Pure-JAX (f32) reference mirroring the PyTorch forward (eval, dropout=0)."""
    h = x.shape[-1]
    x2d = x.reshape(-1, h).astype(jnp.float32)
    mean = jnp.mean(x2d, -1, keepdims=True)
    var = jnp.mean((x2d - mean) ** 2, -1, keepdims=True)
    x_ln = (x2d - mean) / jnp.sqrt(var + eps) * ln_weight + ln_bias
    pre = x_ln @ i2h_weight.T + i2h_bias
    inter = h2o_weight.shape[1]
    if gated:
        hid = _gelu_exact(pre[:, :inter]) * pre[:, inter:]
    else:
        hid = _gelu_exact(pre)
    out = hid @ h2o_weight.T + h2o_bias
    return (out + x2d).reshape(x.shape)


if __name__ == "__main__":
    # Module config: hidden_size=32, intermediate_size=64, activation=gelu,
    # dropout=0.0, eval mode. Check both gated=False and gated=True paths.
    batch, seq, hidden, intermediate = 2, 8, 32, 64
    key = jax.random.PRNGKey(0)
    ks = jax.random.split(key, 8)
    x = jax.random.normal(ks[0], (batch, seq, hidden), dtype=jnp.float32)
    ln_weight = 1.0 + 0.1 * jax.random.normal(ks[1], (hidden,), jnp.float32)
    ln_bias = 0.1 * jax.random.normal(ks[2], (hidden,), jnp.float32)

    for gated in (False, True):
        i2h_out = intermediate * 2 if gated else intermediate
        # deterministic synthetic weights in PyTorch Linear layout (out, in)
        i2h_weight = jax.random.normal(ks[3], (i2h_out, hidden), jnp.float32) * 0.05
        i2h_bias = jax.random.normal(ks[4], (i2h_out,), jnp.float32) * 0.01
        h2o_weight = jax.random.normal(ks[5], (hidden, intermediate), jnp.float32) * 0.05
        h2o_bias = jax.random.normal(ks[6], (hidden,), jnp.float32) * 0.01

        params = prepare_lean_ffn_params(
            ln_weight, ln_bias, i2h_weight, i2h_bias, h2o_weight, h2o_bias,
            gated=gated, mxu_dtype=jnp.bfloat16)

        # tm=8 exercises a multi-step (pipelined) token grid at this toy size.
        out = lean_ffn(x, params, gated=gated, layer_norm_eps=1e-12, tm=8)
        out = jax.block_until_ready(out)

        ref = _reference(x, ln_weight, ln_bias, i2h_weight, i2h_bias,
                         h2o_weight, h2o_bias, gated=gated, eps=1e-12)
        assert out.shape == x.shape
        err = float(jnp.max(jnp.abs(out - ref)))
        # tolerance loosened vs pure-f32 because matmuls run bf16 on the MXU
        assert err < 2e-2, f"gated={gated}: max err {err}"

    print("KERNEL_OK")
</pallas_src>

<mosaic_0001>
module attributes {stable_mosaic.version = 11 : i64} {
  func.func @_ffn_kernel(%arg0: i32, %arg1: memref<8x32xf32, #tpu.memory_space<vmem>>, %arg2: memref<1x32xf32, #tpu.memory_space<vmem>>, %arg3: memref<1x32xf32, #tpu.memory_space<vmem>>, %arg4: memref<32x64xbf16, #tpu.memory_space<vmem>>, %arg5: memref<1x64xf32, #tpu.memory_space<vmem>>, %arg6: memref<64x32xbf16, #tpu.memory_space<vmem>>, %arg7: memref<1x32xf32, #tpu.memory_space<vmem>>, %arg8: memref<8x32xf32, #tpu.memory_space<vmem>>) attributes {dimension_semantics = [#tpu.dimension_semantics<parallel>], iteration_bounds = array<i64: 2>, scalar_prefetch = 0 : i64, scratch_operands = 0 : i64, tpu.core_type = #tpu.core_type<tc>, window_params = [{transform_indices = @transform_0, window_bounds = array<i64: 8, 32>}, {pipeline_mode = #tpu.pipeline_mode<synchronous>, transform_indices = @transform_1, window_bounds = array<i64: 1, 32>}, {pipeline_mode = #tpu.pipeline_mode<synchronous>, transform_indices = @transform_2, window_bounds = array<i64: 1, 32>}, {pipeline_mode = #tpu.pipeline_mode<synchronous>, transform_indices = @transform_3, window_bounds = array<i64: 32, 64>}, {pipeline_mode = #tpu.pipeline_mode<synchronous>, transform_indices = @transform_4, window_bounds = array<i64: 1, 64>}, {pipeline_mode = #tpu.pipeline_mode<synchronous>, transform_indices = @transform_5, window_bounds = array<i64: 64, 32>}, {pipeline_mode = #tpu.pipeline_mode<synchronous>, transform_indices = @transform_6, window_bounds = array<i64: 1, 32>}, {transform_indices = @transform_7, window_bounds = array<i64: 8, 32>}]} {
    %c0 = arith.constant 0 : index
    %c0_0 = arith.constant 0 : index
    %0 = vector.load %arg1[%c0, %c0_0] : memref<8x32xf32, #tpu.memory_space<vmem>>, vector<8x32xf32>
    %c0_1 = arith.constant 0 : index
    %c0_2 = arith.constant 0 : index
    %1 = vector.load %arg2[%c0_1, %c0_2] : memref<1x32xf32, #tpu.memory_space<vmem>>, vector<1x32xf32>
    %c0_3 = arith.constant 0 : index
    %c0_4 = arith.constant 0 : index
    %2 = vector.load %arg3[%c0_3, %c0_4] : memref<1x32xf32, #tpu.memory_space<vmem>>, vector<1x32xf32>
    %cst = arith.constant dense<0.000000e+00> : vector<8xf32>
    %3 = vector.multi_reduction <add>, %0, %cst [1] : vector<8x32xf32> to vector<8xf32>
    %4 = vector.shape_cast %3 : vector<8xf32> to vector<8x1xf32>
    %cst_5 = arith.constant 3.200000e+01 : f32
    %5 = vector.broadcast %cst_5 : f32 to vector<8x1xf32>
    %6 = arith.divf %4, %5 : vector<8x1xf32>
    %7 = vector.broadcast %6 : vector<8x1xf32> to vector<8x32xf32>
    %8 = arith.subf %0, %7 : vector<8x32xf32>
    %9 = arith.mulf %8, %8 : vector<8x32xf32>
    %cst_6 = arith.constant dense<0.000000e+00> : vector<8xf32>
    %10 = vector.multi_reduction <add>, %9, %cst_6 [1] : vector<8x32xf32> to vector<8xf32>
    %11 = vector.shape_cast %10 : vector<8xf32> to vector<8x1xf32>
    %cst_7 = arith.constant 3.200000e+01 : f32
    %12 = vector.broadcast %cst_7 : f32 to vector<8x1xf32>
    %13 = arith.divf %11, %12 : vector<8x1xf32>
    %cst_8 = arith.constant 9.99999996E-13 : f32
    %14 = vector.broadcast %cst_8 : f32 to vector<8x1xf32>
    %15 = arith.addf %13, %14 : vector<8x1xf32>
    %16 = math.rsqrt %15 : vector<8x1xf32>
    %17 = vector.broadcast %16 : vector<8x1xf32> to vector<8x32xf32>
    %18 = arith.mulf %8, %17 : vector<8x32xf32>
    %19 = vector.broadcast %1 : vector<1x32xf32> to vector<8x32xf32>
    %20 = arith.mulf %18, %19 : vector<8x32xf32>
    %21 = vector.broadcast %2 : vector<1x32xf32> to vector<8x32xf32>
    %22 = arith.addf %20, %21 : vector<8x32xf32>
    %23 = arith.truncf %22 : vector<8x32xf32> to vector<8x32xbf16>
    %c0_9 = arith.constant 0 : index
    %c0_10 = arith.constant 0 : index
    %24 = vector.load %arg4[%c0_9, %c0_10] : memref<32x64xbf16, #tpu.memory_space<vmem>>, vector<32x64xbf16>
    %cst_11 = arith.constant dense<0.000000e+00> : vector<8x64xf32>
    %25 = tpu.matmul %23, %24, %cst_11 {dimension_numbers = #tpu.dot_dimension_numbers<[1], [0], [0], [1], [0, 0, 1, 1], [], []>} : vector<8x32xbf16>, vector<32x64xbf16>, vector<8x64xf32> -> vector<8x64xf32>
    %c0_12 = arith.constant 0 : index
    %c0_13 = arith.constant 0 : index
    %26 = vector.load %arg5[%c0_12, %c0_13] : memref<1x64xf32, #tpu.memory_space<vmem>>, vector<1x64xf32>
    %27 = vector.broadcast %26 : vector<1x64xf32> to vector<8x64xf32>
    %28 = arith.addf %25, %27 : vector<8x64xf32>
    %cst_14 = arith.constant 5.000000e-01 : f32
    %29 = vector.broadcast %cst_14 : f32 to vector<8x64xf32>
    %30 = arith.mulf %29, %28 : vector<8x64xf32>
    %cst_15 = arith.constant 0.707106769 : f32
    %31 = vector.broadcast %cst_15 : f32 to vector<8x64xf32>
    %32 = arith.mulf %28, %31 : vector<8x64xf32>
    %33 = math.erf %32 : vector<8x64xf32>
    %cst_16 = arith.constant 1.000000e+00 : f32
    %34 = vector.broadcast %cst_16 : f32 to vector<8x64xf32>
    %35 = arith.addf %34, %33 : vector<8x64xf32>
    %36 = arith.mulf %30, %35 : vector<8x64xf32>
    %37 = arith.truncf %36 : vector<8x64xf32> to vector<8x64xbf16>
    %c0_17 = arith.constant 0 : index
    %c0_18 = arith.constant 0 : index
    %38 = vector.load %arg6[%c0_17, %c0_18] : memref<64x32xbf16, #tpu.memory_space<vmem>>, vector<64x32xbf16>
    %cst_19 = arith.constant dense<0.000000e+00> : vector<8x32xf32>
    %39 = tpu.matmul %37, %38, %cst_19 {dimension_numbers = #tpu.dot_dimension_numbers<[1], [0], [0], [1], [0, 0, 1, 1], [], []>} : vector<8x64xbf16>, vector<64x32xbf16>, vector<8x32xf32> -> vector<8x32xf32>
    %c0_20 = arith.constant 0 : index
    %c0_21 = arith.constant 0 : index
    %40 = vector.load %arg7[%c0_20, %c0_21] : memref<1x32xf32, #tpu.memory_space<vmem>>, vector<1x32xf32>
    %41 = vector.broadcast %40 : vector<1x32xf32> to vector<8x32xf32>
    %42 = arith.addf %39, %41 : vector<8x32xf32>
    %c0_22 = arith.constant 0 : index
    %c0_23 = arith.constant 0 : index
    %43 = vector.load %arg1[%c0_22, %c0_23] : memref<8x32xf32, #tpu.memory_space<vmem>>, vector<8x32xf32>
    %44 = arith.addf %42, %43 : vector<8x32xf32>
    %c0_24 = arith.constant 0 : index
    %c0_25 = arith.constant 0 : index
    %45 = vector.load %arg8[%c0_24, %c0_25] : memref<8x32xf32, #tpu.memory_space<vmem>>, vector<8x32xf32>
    tpu.vector_store %arg8[%c0_24, %c0_25], %44 {strides = array<i32>} : memref<8x32xf32, #tpu.memory_space<vmem>>, vector<8x32xf32>,
    return
  }
  func.func @transform_0(%arg0: i32) -> (i32, i32) {
    %c0_i32 = arith.constant 0 : i32
    %c0_i32_0 = arith.constant 0 : i32
    return %arg0, %c0_i32 : i32, i32
  }
  func.func @transform_1(%arg0: i32) -> (i32, i32) {
    %c0_i32 = arith.constant 0 : i32
    %c0_i32_0 = arith.constant 0 : i32
    %c0_i32_1 = arith.constant 0 : i32
    return %c0_i32, %c0_i32_0 : i32, i32
  }
  func.func @transform_2(%arg0: i32) -> (i32, i32) {
    %c0_i32 = arith.constant 0 : i32
    %c0_i32_0 = arith.constant 0 : i32
    %c0_i32_1 = arith.constant 0 : i32
    return %c0_i32, %c0_i32_0 : i32, i32
  }
  func.func @transform_3(%arg0: i32) -> (i32, i32) {
    %c0_i32 = arith.constant 0 : i32
    %c0_i32_0 = arith.constant 0 : i32
    %c0_i32_1 = arith.constant 0 : i32
    return %c0_i32, %c0_i32_0 : i32, i32
  }
  func.func @transform_4(%arg0: i32) -> (i32, i32) {
    %c0_i32 = arith.constant 0 : i32
    %c0_i32_0 = arith.constant 0 : i32
    %c0_i32_1 = arith.constant 0 : i32
    return %c0_i32, %c0_i32_0 : i32, i32
  }
  func.func @transform_5(%arg0: i32) -> (i32, i32) {
    %c0_i32 = arith.constant 0 : i32
    %c0_i32_0 = arith.constant 0 : i32
    %c0_i32_1 = arith.constant 0 : i32
    return %c0_i32, %c0_i32_0 : i32, i32
  }
  func.func @transform_6(%arg0: i32) -> (i32, i32) {
    %c0_i32 = arith.constant 0 : i32
    %c0_i32_0 = arith.constant 0 : i32
    %c0_i32_1 = arith.constant 0 : i32
    return %c0_i32, %c0_i32_0 : i32, i32
  }
  func.func @transform_7(%arg0: i32) -> (i32, i32) {
    %c0_i32 = arith.constant 0 : i32
    %c0_i32_0 = arith.constant 0 : i32
    return %arg0, %c0_i32 : i32, i32
  }
}

</mosaic_0001>

<bundles_post_ra>
// kernel: tpu_custom_call.1
= control target key start
LH: loop header
LB: loop body
LE: loop exit
PB: predicated region body
PF: predicated region fallthrough
CT: control target
= control target key end

     0   :  { %12 = vsyncpa [#allocation3], 0  ;;  %s885_s0 = inlined_call_operand.vmem [shape: f32[16,32], index: 0, kind: input, shape index: {}]   ;;  %s886_s1 = inlined_call_operand.vmem [shape: f32[1,32], index: 1, kind: input, shape index: {}]   ;;  %s887_s2 = inlined_call_operand.vmem [shape: f32[1,32], index: 2, kind: input, shape index: {}]   ;;  %s888_s3 = inlined_call_operand.vmem [shape: bf16[32,64], index: 3, kind: input, shape index: {}]   ;;  %s889_s4 = inlined_call_operand.vmem [shape: f32[1,64], index: 4, kind: input, shape index: {}]   ;;  %s890_s5 = inlined_call_operand.vmem [shape: bf16[64,32], index: 5, kind: input, shape index: {}]   ;;  %s891_s6 = inlined_call_operand.vmem [shape: f32[1,32], index: 6, kind: input, shape index: {}]   ;;  %s892_s7 = inlined_call_operand.hbm [shape: f32[16,32], index: 7, kind: output, shape index: {}]  }
   0x1   :  { %14 = vsyncpa [#allocation3 + $0x1], 0  ;;  %s746_s24 = smov 0   ;;  %s748_s25 = smov 0  }
   0x2   :  { %s750_s26 = smov 0   ;;  %s752_s27 = smov 0  }
   0x3 LB: > { %s767_s28 = sadd.s32 4294967295, %s701_s27   ;;  %s538_s29 = sadd.s32 4294967294, %s701_s27   ;;  %s701_s27 = sphi %s752_s27, %s898_s27   ;;  %s697_s26 = sphi %s750_s26, %s897_s26   ;;  %s693_s25 = sphi %s748_s25, %s896_s25   ;;  %s689_s24 = sphi %s746_s24, %s895_s24  }
   0x4   : > { %s771_s30 = sadd.s32 1, %s701_s27   ;;  %s179_s8 = sadd.s32 1, %s697_s26 }
   0x5   : > { %s176_s9 = ssub.s32 %s701_s27, %s771_s30  ;;  %p189_p0 = scmp.ne.s32.totalorder %s697_s26, %s693_s25 }
   0x6   : > { %p177_p1 = scmp.eq.s32.totalorder %s176_s9, 0  ;;  %p190_p2 = scmp.eq.s32.totalorder %s767_s28, 1 }
   0x7   : > { %p195_p3 = scmp.ne.s32.totalorder %s693_s25, %s689_s24  ;;  %p196_p4 = scmp.eq.s32.totalorder %s538_s29, 1 }
   0x8   : > { %s782_s10 = scalar_select %p177_p1, %s697_s26, %s179_s8  }
   0x9   : > { %p784_p5 = por %p190_p2, %p189_p0  ;;  %p788_p6 = por %p196_p4, %p195_p3 }
   0xa   : > { %p541_p7 = scmp.ge.s32.totalorder %s701_s27, 1  ;;  %p239_p8 = scmp.lt.s32.totalorder %s701_s27, 3 }
   0xc   : > { %p240_p9 = pnand %p541_p7, %p239_p8 }
   0xd   : > { %p270_p10 = scmp.lt.s32.totalorder (!%p240_p9), %s767_s28, 1  ;;  %vm278_vm0 = vcmask (!%p240_p9), 261120   ;;  %v629_v7 = vld [vmem:[%s888_s3] sm:$0xff] (!%p240_p9)   ;;  %v703_v8 = vmov (!%p240_p9), 0.0   ;;  %v630_v9 = vld [vmem:[%s888_s3 + $0x8] sm:$0xff] (!%p240_p9)   ;;  %vm704_vm1 = vmmov (!%p240_p9), 0  }
   0xe   : > { %243 = sbr.rel (%p240_p9) target bundleno = 804 (0x324), region = 48  ;;  %568 = vmatprep.subr.bf16.mxu0 (!%p240_p9), %v703_v8  ;;  %576 = vmatprep.subr.bf16.mxu1 (!%p240_p9), %v703_v8  ;;  %v544_v14 = vld [vmem:[%s886_s1] ss:$0 sm:$0xff] (!%p240_p9)  ;;  %v632_v21 = vld [vmem:[%s890_s5 + $0x8] sm:$0xff] (!%p240_p9)   ;;  %v633_v22 = vld [vmem:[%s890_s5 + $0x10] sm:$0xff] (!%p240_p9)   ;;  %vm419_vm2 = vcmask (!%p240_p9), 523264  }
   0xf   : > { %569 = vmatpush3.bf16.msra.mxu0 (!%p240_p9), %v629_v7  ;;  %572 = vmatprep.mubr.msk.bf16.mxu0 (!%p240_p9), %vm704_vm1, %v703_v8  ;;  %v545_v16 = vld [vmem:[%s887_s2] ss:$0 sm:$0xff] (!%p240_p9)  ;;  %v634_v23 = vld [vmem:[%s890_s5 + $0x18] sm:$0xff] (!%p240_p9)   ;;  %s267_s22 = sand.u32 (!%p240_p9), 1, %s693_s25   ;;  %s557_s9 = sshll.u32 (!%p240_p9), %s767_s28, 7 }
  0x10   : > { %570 = vmatprep.subr.bf16.mxu0 (!%p240_p9), %v703_v8  ;;  %584 = vmatprep.mubr.msk.bf16.mxu1 (!%p240_p9), %vm704_vm1, %v703_v8  ;;  %v631_v20 = vld [vmem:[%s890_s5] sm:$0xff] (!%p240_p9)   ;;  %s542_s23 = sshll.u32 (!%p240_p9), %s267_s22, 3  ;;  %s705_s19 = smov (!%p240_p9), [#allocation2]  }
  0x11   : > { %577 = vmatpush3.bf16.msra.mxu1 (!%p240_p9), %v631_v20  ;;  %v546_v24 = vld [vmem:[%s889_s4] ss:$0 sm:$0xff] (!%p240_p9)  ;;  %s643_s20 = sshll.u32 (!%p240_p9), %s705_s19, 4  ;;  %s644_s20 = int_to_ptr.vmem [resolvable:$false] %s643_s20 }
  0x12   : > { %578 = vmatprep.subr.bf16.mxu1 (!%p240_p9), %v703_v8  ;;  %v550_v36 = vld [vmem:[%s891_s6] ss:$0 sm:$0xff] (!%p240_p9)  ;;  %s645_s21 = scalar_lea.vmem (!%p240_p9), %s644_s20, 256 }
  0x13   : > { %571 = vmatpush3.bf16.msra.mxu0 (!%p240_p9), %v630_v9 }
  0x15   : > { %s271_s13 = scalar_select %p270_p10, %s767_s28, 1  ;;  %579 = vmatpush3.bf16.msra.mxu1 %v632_v21 }
  0x16   : > { %580 = vmatprep.subr.bf16.mxu1 %v703_v8  ;;  %s466_s28 = scalar_lea.sflag [#allocation3], %s267_s22 }
  0x17   : > { %s543_s14 = sshll.u32 %s271_s13, 3  ;;  %s269_s13 = scalar_lea.vmem [#allocation2], %s542_s23 }
  0x18   : > { %s273_s17 = scalar_lea.vmem %s885_s0, %s543_s14  ;;  %s479_s14 = sshll.u32 %s269_s13, 4  ;;  %s844_s14 = int_to_ptr.vmem [resolvable:$true] %s479_s14 }
  0x19   : > { %v799_v0 = vld [vmem:[%s273_s17] sm:$0xff]  ;;  %581 = vmatpush3.bf16.msra.mxu1 %v633_v22  ;;  %s842_s17 = scalar_lea.hbm %s892_s7, %s557_s9  ;;  %s639_s18 = scalar_lea.vmem %s844_s14, 128 }
  0x1a   : > { %v279_v1 = vsel %vm278_vm0, %v799_v0, 0.0  ;;  %582 = vmatprep.subr.bf16.mxu1 %v703_v8  ;;  %p640_p11 = scmp.ne.s32.totalorder %s844_s14, %s639_s18  ;;  %p646_p0 = scmp.lt.s32.totalorder %s844_s14, %s644_s20 }
  0x1b   : > { %280 = vadd.xlane.f32.xlu0 %v279_v1  ;;  %p647_p1 = scmp.lt.s32.totalorder %s645_s21, %s639_s18 }
  0x1c   : > { %p641_p12 = pnand %p640_p11, %p784_p5 }
  0x1d   : > { %583 = vmatpush3.bf16.msra.mxu1 %v634_v23  ;;  %p648_p2 = por %p647_p1, %p646_p0 }
  0x1e   : > { %p642_p13 = pneg %p641_p12 }
  0x20   : > { %p649_p3 = pnand %p648_p2, %p642_p13 }
  0xa8   : > { %v281_v2 = vpop.xlane.xlu0 %280 }
  0xa9   : > { %v283_v3 = vmul.f32 0.03125, %v281_v2 }
  0xab   : > { %v284_v4 = vsub.f32 %v799_v0, %v283_v3 }
  0xad   : > { %v285_v5 = vmul.f32 %v284_v4, %v284_v4 }
  0xaf   : > { %v286_v6 = vsel %vm278_vm0, %v285_v5, 0.0 }
  0xb0   : > { %287 = vadd.xlane.f32.xlu0 %v286_v6 }
 0x13d   : > { %v288_v10 = vpop.xlane.xlu0 %287 }
 0x13e   : > { %v289_v11 = vmul.f32 0.03125, %v288_v10 }
 0x140   : > { %v290_v12 = vadd.f32 1e-12, %v289_v11 }
 0x142   : > { %635 = vrsqrt.f32 %v290_v12 }
 0x14c   : > { %v636_v13 = vpop.eup %635 }
 0x14d   : > { %v292_v15 = vmul.f32 %v636_v13, %v284_v4 }
 0x14f   : > { %v299_v17 = vmul.f32 %v544_v14, %v292_v15 }
 0x151   : > { %v306_v18 = vadd.f32 %v545_v16, %v299_v17 }
 0x153   : > { %v307_v19 = vpack.c.bf16 %v306_v18, %v306_v18 }
 0x155   : > { %573 = vmatmul.mubr.msk.bf16.vlgmr.msra.gmra.mrb[0].mxu0 %vm278_vm0, %v307_v19 }
 0x228   : > { %v368_v25 = vpop.f32.mrb[0].mxu0 }
 0x229   : > { %v369_v26 = vadd.f32 %v546_v24, %v368_v25  ;;  %v574_v27 = vpop.f32.mrb[1].mxu0 }
 0x22a   : > { %v371_v28 = vpop.f32.mrb[2].mxu0 }
 0x22b   : > { %v375_v29 = vmul.f32 0.70710677, %v369_v26  ;;  %v575_v30 = vpop.f32.mrb[3].mxu0  ;;  %v374_v32 = vmul.f32 0.5, %v369_v26 }
 0x22d   : > { %637 = verf.f32 %v375_v29 }
 0x237   : > { %v638_v31 = vpop.eup %637 }
 0x238   : > { %v377_v33 = vadd.f32 1.0, %v638_v31 }
 0x23a   : > { %v378_v34 = vmul.f32 %v377_v33, %v374_v32 }
 0x23c   : > { %v379_v35 = vpack.c.bf16 %v378_v34, %v378_v34 }
 0x23e   : > { %585 = vmatmul.mubr.msk.bf16.vlgmr.msra.gmra.mrb[0].mxu1 %vm419_vm2, %v379_v35 }
 0x311   : > { %v457_v37 = vpop.f32.mrb[0].mxu1 }
 0x312   : > { %v458_v38 = vadd.f32 %v550_v36, %v457_v37  ;;  %v586_v39 = vpop.f32.mrb[1].mxu1 }
 0x313   : > { %v460_v40 = vpop.f32.mrb[2].mxu1 }
 0x314   : > { %v463_v41 = vadd.f32 %v458_v38, %v799_v0  ;;  %v587_v42 = vpop.f32.mrb[3].mxu1 }
 0x316   : > { %464 = vst.msk [vmem:[%s269_s13] sm:$0xff] %vm278_vm0, %v463_v41 }
 0x317   : > { %652 = shalt.err (!%p649_p3)
}
 0x318   : > { %s653_s22 = scalar_lea.hbm %s842_s17, 128  ;;  %s657_s8 = scalar_lea.hbm %s892_s7, 256 }
 0x319   : > { %p654_p4 = scmp.ne.s32.totalorder %s842_s17, %s653_s22  ;;  %p658_p9 = scmp.lt.u32.totalorder %s842_s17, %s892_s7 }
 0x31a   : > { %p659_p10 = scmp.lt.u32.totalorder %s657_s8, %s653_s22  ;;  %p661_p12 = scmp.lt.u32.totalorder %s653_s22, %s842_s17 }
 0x31b   : > { %p655_p7 = pnand %p654_p4, %p784_p5 }
 0x31c   : > { %p660_p11 = por %p659_p10, %p658_p9 }
 0x31d   : > { %p656_p8 = pneg %p655_p7 }
 0x31e   : > { %p662_p13 = por %p661_p12, %p660_p11 }
 0x320   : > { %p663_p0 = pnand %p662_p13, %p656_p8 }
 0x322   : > { %666 = shalt.err (!%p663_p0)
}
 0x323   : > { %588 = dma.vmem_to_hbm [thread:$0]  (%p784_p5), %s844_s14, 128, %s842_s17, %s466_s28  }
 0x324 PF: > { %p594_p1 = scmp.ge.s32.totalorder %s701_s27, 2  ;;  %s491_s15 = sand.u32 1, %s689_s24  }
 0x325   : > { %s492_s16 = scalar_lea.sflag [#allocation3], %s491_s15 }
 0x326   : > { %p591_p2 = pnand %p594_p1, %p788_p6 }
 0x328   : > { %684 = dma.done.wait (!%p591_p2), %s492_s16, 128  }
 0x329   : > { %686 = vsyncadd (!%p591_p2), %s492_s16, 4294967168  ;;  %p17_p3 = scmp.ge.s32.totalorder %s771_s30, 4   ;;  %s895_s24 = smov %s693_s25 }
 0x32a   : > { %s896_s25 = smov %s697_s26  ;;  %s897_s26 = smov %s782_s10 }
 0x32b   : > { %s898_s27 = smov %s771_s30  ;;  %19 = sbr.rel (!%p17_p3) target bundleno = 3 (0x3), region = 83 }
 0x332   :  { %497 = vsyncpa [#allocation3], 1 }
 0x333   :  { %499 = vsyncpa [#allocation3 + $0x1], 1 }

</bundles_post_ra>
